<compile_context>
chip_gen: v7x
topology: tpu7x:2x2x1
jax: 0.10.0
libtpu: 0.0.40
codegen_flags: <defaults>
</compile_context>

<pallas_src>
import functools

import jax
import jax.numpy as jnp
from jax import lax
from jax.experimental import pallas as pl
from jax.experimental.pallas import tpu as pltpu


def _mha_head_kernel(*refs, has_mask, return_attention, compute_dtype):
    (q_in_ref, k_in_ref, v_in_ref,
     wq_ref, wk_ref, wv_ref,
     bq_ref, bk_ref, bv_ref,
     wo_ref, bo_ref) = refs[:11]
    idx = 11
    mask_ref = refs[idx] if has_mask else None
    if has_mask:
        idx += 1
    out_ref = refs[idx]
    attn_ref = refs[idx + 1] if return_attention else None
    acc_ref = refs[-1]

    h = pl.program_id(1)
    cd = compute_dtype

    x_q = q_in_ref[0]                      # (S, hid), already compute_dtype
    x_k = k_in_ref[0]
    x_v = v_in_ref[0]

    # Per-head projections: contraction depth = hid (full MXU fill), narrow output.
    # 1/sqrt(head_dim) is already folded into wq/bq by the wrapper.
    q_h = jnp.dot(x_q, wq_ref[0], preferred_element_type=jnp.float32) + bq_ref[0]
    k_h = jnp.dot(x_k, wk_ref[0], preferred_element_type=jnp.float32) + bk_ref[0]
    v_h = jnp.dot(x_v, wv_ref[0], preferred_element_type=jnp.float32) + bv_ref[0]

    # energy = (Q/sqrt(hd)) K^T ; contract K's last dim directly (no XLU transpose).
    energy = lax.dot_general(q_h.astype(cd), k_h.astype(cd),
                             (((1,), (1,)), ((), ())),
                             preferred_element_type=jnp.float32)
    if has_mask:
        # Compact mask block (1, 1, mq, S); (mq, S) broadcasts against (S, S).
        energy = jnp.where(mask_ref[0, 0] == 0, jnp.float32(-1e10), energy)

    # Numerically stable softmax, all f32; reciprocal on the EUP (approx ~1e-4 rel).
    m = jnp.max(energy, axis=-1, keepdims=True)
    e = jnp.exp(energy - m)
    attn = e * pl.reciprocal(jnp.sum(e, axis=-1, keepdims=True), approx=True)
    if return_attention:
        attn_ref[0, 0] = attn.astype(attn_ref.dtype)

    # dropout(attention): identity (eval mode).
    ctx = jnp.dot(attn.astype(cd), v_h.astype(cd),
                  preferred_element_type=jnp.float32)          # (S, hd)

    # Fused fc_o: this head's context only touches rows h*hd:(h+1)*hd of Wo^T,
    # delivered as a per-head (hd, hid) block -> accumulate into VMEM scratch.
    head_out = jnp.dot(ctx.astype(cd), wo_ref[0],
                       preferred_element_type=jnp.float32)     # (S, hid)

    @pl.when(h == 0)
    def _():
        acc_ref[...] = jnp.zeros_like(acc_ref)

    acc_ref[...] += head_out

    @pl.when(h == pl.num_programs(1) - 1)
    def _():
        out_ref[0] = (acc_ref[...] + bo_ref[...]).astype(out_ref.dtype)


@functools.partial(
    jax.jit,
    static_argnames=("n_heads", "return_attention", "compute_dtype", "attention_dtype"))
def multi_head_attention(query, key, value, params, *, n_heads, mask=None,
                         return_attention=True, compute_dtype=jnp.float32,
                         attention_dtype=jnp.float32):
    """Pallas TPU implementation of MultiHeadAttentionLayer.forward.

    mask (optional) must be broadcastable to (B, n_heads, S_q, S_k); entries == 0
    are filled with -1e10 before softmax (matches masked_fill in the module).
    compute_dtype=jnp.bfloat16 runs MXU matmuls in bf16 (f32 accumulation,
    f32 softmax) — beneficial on v5e / v6e / v7x.  attention_dtype controls the
    dtype of the returned attention tensor (bf16 halves its HBM writeback).
    """
    B, S, hid = query.shape
    assert hid % n_heads == 0
    head_dim = hid // n_heads
    inv_scale = 1.0 / float(head_dim) ** 0.5
    out_dtype = query.dtype
    cd = compute_dtype

    # PyTorch Linear: y = x @ W^T + b.  Split W^T per head so the kernel never
    # lane-slices; fold the softmax scale into the Q projection.
    def proj_weight(w, scale):
        wt = jnp.asarray(w).T * scale                      # (hid_in, hid_out)
        return wt.reshape(hid, n_heads, head_dim).transpose(1, 0, 2).astype(cd)

    wq_h = proj_weight(params["wq"], inv_scale)            # (H, hid, hd)
    wk_h = proj_weight(params["wk"], 1.0)
    wv_h = proj_weight(params["wv"], 1.0)
    wo_h = jnp.asarray(params["wo"]).T.reshape(n_heads, head_dim, hid).astype(cd)

    bq_h = (jnp.asarray(params["bq"]).astype(jnp.float32) * inv_scale
            ).reshape(n_heads, 1, head_dim)
    bk_h = jnp.asarray(params["bk"]).astype(jnp.float32).reshape(n_heads, 1, head_dim)
    bv_h = jnp.asarray(params["bv"]).astype(jnp.float32).reshape(n_heads, 1, head_dim)
    bo = jnp.asarray(params["bo"]).astype(jnp.float32).reshape(1, hid)

    # Cast activations once in the wrapper (halves input DMA in bf16 mode).
    q_in = query.astype(cd)
    k_in = key.astype(cd)
    v_in = value.astype(cd)

    seq_spec = pl.BlockSpec((1, S, hid), lambda b, h: (b, 0, 0))   # resident across h
    w_spec = pl.BlockSpec((1, hid, head_dim), lambda b, h: (h, 0, 0))
    wo_spec = pl.BlockSpec((1, head_dim, hid), lambda b, h: (h, 0, 0))
    b_spec = pl.BlockSpec((1, 1, head_dim), lambda b, h: (h, 0, 0))
    bo_spec = pl.BlockSpec((1, hid), lambda b, h: (0, 0))

    in_specs = [seq_spec, seq_spec, seq_spec,
                w_spec, w_spec, w_spec,
                b_spec, b_spec, b_spec,
                wo_spec, bo_spec]
    args = [q_in, k_in, v_in, wq_h, wk_h, wv_h, bq_h, bk_h, bv_h, wo_h, bo]

    has_mask = mask is not None
    mask_block_bytes = 0
    if has_mask:
        m = jnp.asarray(mask)
        assert m.ndim <= 4
        m = m.reshape((1,) * (4 - m.ndim) + m.shape)
        _, mh, mq, mk = m.shape
        assert mh in (1, n_heads) and mq in (1, S)
        # Keep head / query extents compact; broadcast only batch and key dims.
        m = jnp.broadcast_to(m, (B, mh, mq, S)).astype(jnp.int8)
        if mh == n_heads:
            mask_spec = pl.BlockSpec((1, 1, mq, S), lambda b, h: (b, h, 0, 0))
        else:
            mask_spec = pl.BlockSpec((1, 1, mq, S), lambda b, h: (b, 0, 0, 0))
        in_specs.append(mask_spec)
        args.append(m)
        mask_block_bytes = mq * S

    out_shapes = [jax.ShapeDtypeStruct((B, S, hid), out_dtype)]
    out_specs = [pl.BlockSpec((1, S, hid), lambda b, h: (b, 0, 0))]
    if return_attention:
        out_shapes.append(jax.ShapeDtypeStruct((B, n_heads, S, S), attention_dtype))
        out_specs.append(pl.BlockSpec((1, 1, S, S), lambda b, h: (b, h, 0, 0)))

    # Explicit scoped-VMEM budget from the actual block sum (double-buffered
    # blocks + f32 accumulator scratch), clamped to the v7x physical ceiling.
    ws = jnp.dtype(cd).itemsize
    od = jnp.dtype(out_dtype).itemsize
    ad = jnp.dtype(attention_dtype).itemsize
    per_step = (3 * S * hid * ws                 # q, k, v activation blocks
                + 3 * hid * head_dim * ws        # per-head projection weights
                + 3 * head_dim * 4               # per-head projection biases
                + head_dim * hid * ws            # per-head fc_o weight block
                + hid * 4                        # fc_o bias
                + mask_block_bytes
                + S * hid * od                   # output block
                + (S * S * ad if return_attention else 0))
    vmem_bytes = 2 * per_step + S * hid * 4 + (2 << 20)
    vmem_limit = int(min(max(vmem_bytes, 16 << 20), 64 << 20))

    flops = 2 * B * (4 * S * hid * hid + 2 * S * S * hid)
    transcendentals = B * n_heads * S * S
    bytes_accessed = (3 * B * S * hid * ws + 4 * hid * hid * ws
                      + B * S * hid * od
                      + (B * n_heads * S * S * ad if return_attention else 0)
                      + (B * mask_block_bytes if has_mask else 0))

    kernel = functools.partial(
        _mha_head_kernel, has_mask=has_mask,
        return_attention=return_attention, compute_dtype=cd)

    res = pl.pallas_call(
        kernel,
        out_shape=tuple(out_shapes),
        grid_spec=pltpu.PrefetchScalarGridSpec(
            num_scalar_prefetch=0,
            grid=(B, n_heads),
            in_specs=in_specs,
            out_specs=tuple(out_specs),
            scratch_shapes=[pltpu.VMEM((S, hid), jnp.float32)],
        ),
        compiler_params=pltpu.CompilerParams(
            dimension_semantics=("parallel", "arbitrary"),
            vmem_limit_bytes=vmem_limit),
        cost_estimate=pl.CostEstimate(flops=flops,
                                      transcendentals=transcendentals,
                                      bytes_accessed=bytes_accessed),
    )(*args)

    out = res[0]
    attn = res[1] if return_attention else None
    return out, attn


# ---------------------------------------------------------------------------
# Pure-JAX reference (mirrors the PyTorch forward) for correctness checking.
# ---------------------------------------------------------------------------
def reference(query, key, value, params, *, n_heads, mask=None):
    B, S, hid = query.shape
    hd = hid // n_heads
    scale = jnp.sqrt(jnp.float32(hd))

    def lin(x, w, b):
        return x @ w.T + b

    Q = lin(query, params["wq"], params["bq"]).reshape(B, S, n_heads, hd).transpose(0, 2, 1, 3)
    K = lin(key, params["wk"], params["bk"]).reshape(B, S, n_heads, hd).transpose(0, 2, 1, 3)
    V = lin(value, params["wv"], params["bv"]).reshape(B, S, n_heads, hd).transpose(0, 2, 1, 3)
    energy = jnp.einsum("bhqd,bhkd->bhqk", Q, K) / scale
    if mask is not None:
        energy = jnp.where(mask == 0, -1e10, energy)
    attn = jax.nn.softmax(energy, axis=-1)
    x = jnp.einsum("bhqk,bhkd->bhqd", attn, V)
    x = x.transpose(0, 2, 1, 3).reshape(B, S, hid)
    x = lin(x, params["wo"], params["bo"])
    return x, attn


if __name__ == "__main__":
    B, S, HID, H = 2, 8, 32, 4

    key0 = jax.random.PRNGKey(0)
    ks = jax.random.split(key0, 11)
    query = jax.random.normal(ks[0], (B, S, HID), jnp.float32)
    key_in = jax.random.normal(ks[1], (B, S, HID), jnp.float32)
    value = jax.random.normal(ks[2], (B, S, HID), jnp.float32)

    s = 1.0 / float(HID) ** 0.5
    params = {
        "wq": jax.random.uniform(ks[3], (HID, HID), jnp.float32, -s, s),
        "bq": jax.random.uniform(ks[4], (HID,), jnp.float32, -s, s),
        "wk": jax.random.uniform(ks[5], (HID, HID), jnp.float32, -s, s),
        "bk": jax.random.uniform(ks[6], (HID,), jnp.float32, -s, s),
        "wv": jax.random.uniform(ks[7], (HID, HID), jnp.float32, -s, s),
        "bv": jax.random.uniform(ks[8], (HID,), jnp.float32, -s, s),
        "wo": jax.random.uniform(ks[9], (HID, HID), jnp.float32, -s, s),
        "bo": jax.random.uniform(ks[10], (HID,), jnp.float32, -s, s),
    }

    out_ref, attn_ref = reference(query, key_in, value, params, n_heads=H)

    # ---- f32 path, no mask ----
    out, attn = multi_head_attention(query, key_in, value, params, n_heads=H)
    out = jax.block_until_ready(out)
    attn = jax.block_until_ready(attn)
    assert jnp.allclose(out, out_ref, atol=2e-3, rtol=2e-3), "f32 output mismatch"
    assert jnp.allclose(attn, attn_ref, atol=2e-3, rtol=2e-3), "f32 attention mismatch"

    # ---- f32 path, compact key-padding mask (masked_fill parity) ----
    lengths = jnp.array([S, S // 2], dtype=jnp.int32)
    mask = jnp.arange(S)[None, None, None, :] < lengths[:, None, None, None]  # (B,1,1,S)
    out_m, attn_m = multi_head_attention(query, key_in, value, params,
                                         n_heads=H, mask=mask)
    out_m = jax.block_until_ready(out_m)
    out_mr, attn_mr = reference(query, key_in, value, params, n_heads=H, mask=mask)
    assert jnp.allclose(out_m, out_mr, atol=2e-3, rtol=2e-3), "masked output mismatch"
    assert jnp.allclose(attn_m, attn_mr, atol=2e-3, rtol=2e-3), "masked attention mismatch"

    # ---- bf16 MXU path (+ bf16 attention writeback), looser tolerance ----
    out_bf, attn_bf = multi_head_attention(query, key_in, value, params, n_heads=H,
                                           compute_dtype=jnp.bfloat16,
                                           attention_dtype=jnp.bfloat16)
    out_bf = jax.block_until_ready(out_bf)
    assert jnp.allclose(out_bf, out_ref, atol=5e-2, rtol=5e-2), "bf16 output mismatch"
    assert jnp.allclose(attn_bf.astype(jnp.float32), attn_ref,
                        atol=5e-2, rtol=5e-2), "bf16 attention mismatch"

    # ---- skip the O(S^2) attention writeback when it is not needed ----
    out_na, attn_na = multi_head_attention(query, key_in, value, params, n_heads=H,
                                           return_attention=False)
    out_na = jax.block_until_ready(out_na)
    assert attn_na is None
    assert jnp.allclose(out_na, out_ref, atol=2e-3, rtol=2e-3), "no-attn output mismatch"

    print("KERNEL_OK")
</pallas_src>

<mosaic_0001>
module attributes {stable_mosaic.version = 11 : i64} {
  func.func @_mha_head_kernel(%arg0: i32, %arg1: i32, %arg2: memref<1x8x32xf32, #tpu.memory_space<vmem>>, %arg3: memref<1x8x32xf32, #tpu.memory_space<vmem>>, %arg4: memref<1x8x32xf32, #tpu.memory_space<vmem>>, %arg5: memref<1x32x8xf32, #tpu.memory_space<vmem>>, %arg6: memref<1x32x8xf32, #tpu.memory_space<vmem>>, %arg7: memref<1x32x8xf32, #tpu.memory_space<vmem>>, %arg8: memref<1x1x8xf32, #tpu.memory_space<vmem>>, %arg9: memref<1x1x8xf32, #tpu.memory_space<vmem>>, %arg10: memref<1x1x8xf32, #tpu.memory_space<vmem>>, %arg11: memref<1x8x32xf32, #tpu.memory_space<vmem>>, %arg12: memref<1x32xf32, #tpu.memory_space<vmem>>, %arg13: memref<1x8x32xf32, #tpu.memory_space<vmem>>, %arg14: memref<1x1x8x8xf32, #tpu.memory_space<vmem>>, %arg15: memref<8x32xf32, #tpu.memory_space<vmem>>) attributes {dimension_semantics = [#tpu.dimension_semantics<parallel>, #tpu.dimension_semantics<arbitrary>], iteration_bounds = array<i64: 2, 4>, scalar_prefetch = 0 : i64, scratch_operands = 1 : i64, tpu.core_type = #tpu.core_type<tc>, window_params = [{transform_indices = @transform_0, window_bounds = array<i64: 1, 8, 32>}, {transform_indices = @transform_1, window_bounds = array<i64: 1, 8, 32>}, {transform_indices = @transform_2, window_bounds = array<i64: 1, 8, 32>}, {transform_indices = @transform_3, window_bounds = array<i64: 1, 32, 8>}, {transform_indices = @transform_4, window_bounds = array<i64: 1, 32, 8>}, {transform_indices = @transform_5, window_bounds = array<i64: 1, 32, 8>}, {transform_indices = @transform_6, window_bounds = array<i64: 1, 1, 8>}, {transform_indices = @transform_7, window_bounds = array<i64: 1, 1, 8>}, {transform_indices = @transform_8, window_bounds = array<i64: 1, 1, 8>}, {transform_indices = @transform_9, window_bounds = array<i64: 1, 8, 32>}, {pipeline_mode = #tpu.pipeline_mode<synchronous>, transform_indices = @transform_10, window_bounds = array<i64: 1, 32>}, {transform_indices = @transform_11, window_bounds = array<i64: 1, 8, 32>}, {transform_indices = @transform_12, window_bounds = array<i64: 1, 1, 8, 8>}]} {
    %c0 = arith.constant 0 : index
    %c0_0 = arith.constant 0 : index
    %c0_1 = arith.constant 0 : index
    %0 = vector.load %arg2[%c0, %c0_0, %c0_1] : memref<1x8x32xf32, #tpu.memory_space<vmem>>, vector<1x8x32xf32>
    %1 = vector.shape_cast %0 : vector<1x8x32xf32> to vector<8x32xf32>
    %c0_2 = arith.constant 0 : index
    %c0_3 = arith.constant 0 : index
    %c0_4 = arith.constant 0 : index
    %2 = vector.load %arg3[%c0_2, %c0_3, %c0_4] : memref<1x8x32xf32, #tpu.memory_space<vmem>>, vector<1x8x32xf32>
    %3 = vector.shape_cast %2 : vector<1x8x32xf32> to vector<8x32xf32>
    %c0_5 = arith.constant 0 : index
    %c0_6 = arith.constant 0 : index
    %c0_7 = arith.constant 0 : index
    %4 = vector.load %arg4[%c0_5, %c0_6, %c0_7] : memref<1x8x32xf32, #tpu.memory_space<vmem>>, vector<1x8x32xf32>
    %5 = vector.shape_cast %4 : vector<1x8x32xf32> to vector<8x32xf32>
    %c0_8 = arith.constant 0 : index
    %c0_9 = arith.constant 0 : index
    %c0_10 = arith.constant 0 : index
    %6 = vector.load %arg5[%c0_8, %c0_9, %c0_10] : memref<1x32x8xf32, #tpu.memory_space<vmem>>, vector<1x32x8xf32>
    %7 = vector.shape_cast %6 : vector<1x32x8xf32> to vector<32x8xf32>
    %cst = arith.constant dense<0.000000e+00> : vector<8x8xf32>
    %8 = tpu.matmul %1, %7, %cst {dimension_numbers = #tpu.dot_dimension_numbers<[1], [0], [0], [1], [0, 0, 1, 1], [], []>} : vector<8x32xf32>, vector<32x8xf32>, vector<8x8xf32> -> vector<8x8xf32>
    %c0_11 = arith.constant 0 : index
    %c0_12 = arith.constant 0 : index
    %c0_13 = arith.constant 0 : index
    %9 = vector.load %arg8[%c0_11, %c0_12, %c0_13] : memref<1x1x8xf32, #tpu.memory_space<vmem>>, vector<1x1x8xf32>
    %10 = vector.shape_cast %9 : vector<1x1x8xf32> to vector<1x8xf32>
    %11 = vector.broadcast %10 : vector<1x8xf32> to vector<8x8xf32>
    %12 = arith.addf %8, %11 : vector<8x8xf32>
    %c0_14 = arith.constant 0 : index
    %c0_15 = arith.constant 0 : index
    %c0_16 = arith.constant 0 : index
    %13 = vector.load %arg6[%c0_14, %c0_15, %c0_16] : memref<1x32x8xf32, #tpu.memory_space<vmem>>, vector<1x32x8xf32>
    %14 = vector.shape_cast %13 : vector<1x32x8xf32> to vector<32x8xf32>
    %cst_17 = arith.constant dense<0.000000e+00> : vector<8x8xf32>
    %15 = tpu.matmul %3, %14, %cst_17 {dimension_numbers = #tpu.dot_dimension_numbers<[1], [0], [0], [1], [0, 0, 1, 1], [], []>} : vector<8x32xf32>, vector<32x8xf32>, vector<8x8xf32> -> vector<8x8xf32>
    %c0_18 = arith.constant 0 : index
    %c0_19 = arith.constant 0 : index
    %c0_20 = arith.constant 0 : index
    %16 = vector.load %arg9[%c0_18, %c0_19, %c0_20] : memref<1x1x8xf32, #tpu.memory_space<vmem>>, vector<1x1x8xf32>
    %17 = vector.shape_cast %16 : vector<1x1x8xf32> to vector<1x8xf32>
    %18 = vector.broadcast %17 : vector<1x8xf32> to vector<8x8xf32>
    %19 = arith.addf %15, %18 : vector<8x8xf32>
    %c0_21 = arith.constant 0 : index
    %c0_22 = arith.constant 0 : index
    %c0_23 = arith.constant 0 : index
    %20 = vector.load %arg7[%c0_21, %c0_22, %c0_23] : memref<1x32x8xf32, #tpu.memory_space<vmem>>, vector<1x32x8xf32>
    %21 = vector.shape_cast %20 : vector<1x32x8xf32> to vector<32x8xf32>
    %cst_24 = arith.constant dense<0.000000e+00> : vector<8x8xf32>
    %22 = tpu.matmul %5, %21, %cst_24 {dimension_numbers = #tpu.dot_dimension_numbers<[1], [0], [0], [1], [0, 0, 1, 1], [], []>} : vector<8x32xf32>, vector<32x8xf32>, vector<8x8xf32> -> vector<8x8xf32>
    %c0_25 = arith.constant 0 : index
    %c0_26 = arith.constant 0 : index
    %c0_27 = arith.constant 0 : index
    %23 = vector.load %arg10[%c0_25, %c0_26, %c0_27] : memref<1x1x8xf32, #tpu.memory_space<vmem>>, vector<1x1x8xf32>
    %24 = vector.shape_cast %23 : vector<1x1x8xf32> to vector<1x8xf32>
    %25 = vector.broadcast %24 : vector<1x8xf32> to vector<8x8xf32>
    %26 = arith.addf %22, %25 : vector<8x8xf32>
    %cst_28 = arith.constant dense<0.000000e+00> : vector<8x8xf32>
    %27 = tpu.matmul %12, %19, %cst_28 {dimension_numbers = #tpu.dot_dimension_numbers<[1], [1], [0], [0], [0, 0, 1, 0], [], []>} : vector<8x8xf32>, vector<8x8xf32>, vector<8x8xf32> -> vector<8x8xf32>
    %cst_29 = arith.constant dense<0xFF800000> : vector<8xf32>
    %28 = vector.multi_reduction <maximumf>, %27, %cst_29 [1] : vector<8x8xf32> to vector<8xf32>
    %29 = vector.shape_cast %28 : vector<8xf32> to vector<8x1xf32>
    %30 = vector.broadcast %29 : vector<8x1xf32> to vector<8x8xf32>
    %31 = arith.subf %27, %30 : vector<8x8xf32>
    %32 = math.exp %31 : vector<8x8xf32>
    %cst_30 = arith.constant dense<0.000000e+00> : vector<8xf32>
    %33 = vector.multi_reduction <add>, %32, %cst_30 [1] : vector<8x8xf32> to vector<8xf32>
    %34 = vector.shape_cast %33 : vector<8xf32> to vector<8x1xf32>
    %35 = tpu.reciprocal %34 {approx = true} : vector<8x1xf32> -> vector<8x1xf32>
    %36 = vector.broadcast %35 : vector<8x1xf32> to vector<8x8xf32>
    %37 = arith.mulf %32, %36 : vector<8x8xf32>
    %c0_31 = arith.constant 0 : index
    %c0_32 = arith.constant 0 : index
    %c0_33 = arith.constant 0 : index
    %c0_34 = arith.constant 0 : index
    %38 = vector.load %arg14[%c0_31, %c0_32, %c0_33, %c0_34] : memref<1x1x8x8xf32, #tpu.memory_space<vmem>>, vector<1x1x8x8xf32>
    %39 = vector.shape_cast %38 : vector<1x1x8x8xf32> to vector<8x8xf32>
    %40 = vector.shape_cast %37 : vector<8x8xf32> to vector<1x1x8x8xf32>
    tpu.vector_store %arg14[%c0_31, %c0_32, %c0_33, %c0_34], %40 {strides = array<i32>} : memref<1x1x8x8xf32, #tpu.memory_space<vmem>>, vector<1x1x8x8xf32>,
    %cst_35 = arith.constant dense<0.000000e+00> : vector<8x8xf32>
    %41 = tpu.matmul %37, %26, %cst_35 {dimension_numbers = #tpu.dot_dimension_numbers<[1], [0], [0], [1], [0, 0, 1, 1], [], []>} : vector<8x8xf32>, vector<8x8xf32>, vector<8x8xf32> -> vector<8x8xf32>
    %c0_36 = arith.constant 0 : index
    %c0_37 = arith.constant 0 : index
    %c0_38 = arith.constant 0 : index
    %42 = vector.load %arg11[%c0_36, %c0_37, %c0_38] : memref<1x8x32xf32, #tpu.memory_space<vmem>>, vector<1x8x32xf32>
    %43 = vector.shape_cast %42 : vector<1x8x32xf32> to vector<8x32xf32>
    %cst_39 = arith.constant dense<0.000000e+00> : vector<8x32xf32>
    %44 = tpu.matmul %41, %43, %cst_39 {dimension_numbers = #tpu.dot_dimension_numbers<[1], [0], [0], [1], [0, 0, 1, 1], [], []>} : vector<8x8xf32>, vector<8x32xf32>, vector<8x32xf32> -> vector<8x32xf32>
    %c0_i32 = arith.constant 0 : i32
    %45 = arith.cmpi eq, %arg1, %c0_i32 : i32
    %46 = arith.extui %45 : i1 to i32
    %c0_i32_40 = arith.constant 0 : i32
    %47 = arith.cmpi ne, %46, %c0_i32_40 : i32
    scf.if %47 {
      %cst_46 = arith.constant 0.000000e+00 : f32
      %54 = vector.broadcast %cst_46 : f32 to vector<8x32xf32>
      %c0_47 = arith.constant 0 : index
      %c0_48 = arith.constant 0 : index
      %55 = vector.load %arg15[%c0_47, %c0_48] : memref<8x32xf32, #tpu.memory_space<vmem>>, vector<8x32xf32>
      tpu.vector_store %arg15[%c0_47, %c0_48], %54 {strides = array<i32>} : memref<8x32xf32, #tpu.memory_space<vmem>>, vector<8x32xf32>,
    } else {
    }
    %c0_41 = arith.constant 0 : index
    %c0_42 = arith.constant 0 : index
    %48 = vector.load %arg15[%c0_41, %c0_42] : memref<8x32xf32, #tpu.memory_space<vmem>>, vector<8x32xf32>
    %49 = arith.addf %48, %44 : vector<8x32xf32>
    %c0_43 = arith.constant 0 : index
    %c0_44 = arith.constant 0 : index
    %50 = vector.load %arg15[%c0_43, %c0_44] : memref<8x32xf32, #tpu.memory_space<vmem>>, vector<8x32xf32>
    tpu.vector_store %arg15[%c0_43, %c0_44], %49 {strides = array<i32>} : memref<8x32xf32, #tpu.memory_space<vmem>>, vector<8x32xf32>,
    %c3_i32 = arith.constant 3 : i32
    %51 = arith.cmpi eq, %arg1, %c3_i32 : i32
    %52 = arith.extui %51 : i1 to i32
    %c0_i32_45 = arith.constant 0 : i32
    %53 = arith.cmpi ne, %52, %c0_i32_45 : i32
    scf.if %53 {
      %c0_46 = arith.constant 0 : index
      %c0_47 = arith.constant 0 : index
      %54 = vector.load %arg15[%c0_46, %c0_47] : memref<8x32xf32, #tpu.memory_space<vmem>>, vector<8x32xf32>
      %c0_48 = arith.constant 0 : index
      %c0_49 = arith.constant 0 : index
      %55 = vector.load %arg12[%c0_48, %c0_49] : memref<1x32xf32, #tpu.memory_space<vmem>>, vector<1x32xf32>
      %56 = vector.broadcast %55 : vector<1x32xf32> to vector<8x32xf32>
      %57 = arith.addf %54, %56 : vector<8x32xf32>
      %c0_50 = arith.constant 0 : index
      %c0_51 = arith.constant 0 : index
      %c0_52 = arith.constant 0 : index
      %58 = vector.load %arg13[%c0_50, %c0_51, %c0_52] : memref<1x8x32xf32, #tpu.memory_space<vmem>>, vector<1x8x32xf32>
      %59 = vector.shape_cast %58 : vector<1x8x32xf32> to vector<8x32xf32>
      %60 = vector.shape_cast %57 : vector<8x32xf32> to vector<1x8x32xf32>
      tpu.vector_store %arg13[%c0_50, %c0_51, %c0_52], %60 {strides = array<i32>} : memref<1x8x32xf32, #tpu.memory_space<vmem>>, vector<1x8x32xf32>,
    } else {
    }
    return
  }
  func.func @transform_0(%arg0: i32, %arg1: i32) -> (i32, i32, i32) {
    %c0_i32 = arith.constant 0 : i32
    %c0_i32_0 = arith.constant 0 : i32
    %c0_i32_1 = arith.constant 0 : i32
    return %arg0, %c0_i32, %c0_i32_0 : i32, i32, i32
  }
  func.func @transform_1(%arg0: i32, %arg1: i32) -> (i32, i32, i32) {
    %c0_i32 = arith.constant 0 : i32
    %c0_i32_0 = arith.constant 0 : i32
    %c0_i32_1 = arith.constant 0 : i32
    return %arg0, %c0_i32, %c0_i32_0 : i32, i32, i32
  }
  func.func @transform_2(%arg0: i32, %arg1: i32) -> (i32, i32, i32) {
    %c0_i32 = arith.constant 0 : i32
    %c0_i32_0 = arith.constant 0 : i32
    %c0_i32_1 = arith.constant 0 : i32
    return %arg0, %c0_i32, %c0_i32_0 : i32, i32, i32
  }
  func.func @transform_3(%arg0: i32, %arg1: i32) -> (i32, i32, i32) {
    %c0_i32 = arith.constant 0 : i32
    %c0_i32_0 = arith.constant 0 : i32
    %c0_i32_1 = arith.constant 0 : i32
    return %arg1, %c0_i32, %c0_i32_0 : i32, i32, i32
  }
  func.func @transform_4(%arg0: i32, %arg1: i32) -> (i32, i32, i32) {
    %c0_i32 = arith.constant 0 : i32
    %c0_i32_0 = arith.constant 0 : i32
    %c0_i32_1 = arith.constant 0 : i32
    return %arg1, %c0_i32, %c0_i32_0 : i32, i32, i32
  }
  func.func @transform_5(%arg0: i32, %arg1: i32) -> (i32, i32, i32) {
    %c0_i32 = arith.constant 0 : i32
    %c0_i32_0 = arith.constant 0 : i32
    %c0_i32_1 = arith.constant 0 : i32
    return %arg1, %c0_i32, %c0_i32_0 : i32, i32, i32
  }
  func.func @transform_6(%arg0: i32, %arg1: i32) -> (i32, i32, i32) {
    %c0_i32 = arith.constant 0 : i32
    %c0_i32_0 = arith.constant 0 : i32
    %c0_i32_1 = arith.constant 0 : i32
    return %arg1, %c0_i32, %c0_i32_0 : i32, i32, i32
  }
  func.func @transform_7(%arg0: i32, %arg1: i32) -> (i32, i32, i32) {
    %c0_i32 = arith.constant 0 : i32
    %c0_i32_0 = arith.constant 0 : i32
    %c0_i32_1 = arith.constant 0 : i32
    return %arg1, %c0_i32, %c0_i32_0 : i32, i32, i32
  }
  func.func @transform_8(%arg0: i32, %arg1: i32) -> (i32, i32, i32) {
    %c0_i32 = arith.constant 0 : i32
    %c0_i32_0 = arith.constant 0 : i32
    %c0_i32_1 = arith.constant 0 : i32
    return %arg1, %c0_i32, %c0_i32_0 : i32, i32, i32
  }
  func.func @transform_9(%arg0: i32, %arg1: i32) -> (i32, i32, i32) {
    %c0_i32 = arith.constant 0 : i32
    %c0_i32_0 = arith.constant 0 : i32
    %c0_i32_1 = arith.constant 0 : i32
    return %arg1, %c0_i32, %c0_i32_0 : i32, i32, i32
  }
  func.func @transform_10(%arg0: i32, %arg1: i32) -> (i32, i32) {
    %c0_i32 = arith.constant 0 : i32
    %c0_i32_0 = arith.constant 0 : i32
    %c0_i32_1 = arith.constant 0 : i32
    return %c0_i32, %c0_i32_0 : i32, i32
  }
  func.func @transform_11(%arg0: i32, %arg1: i32) -> (i32, i32, i32) {
    %c0_i32 = arith.constant 0 : i32
    %c0_i32_0 = arith.constant 0 : i32
    %c0_i32_1 = arith.constant 0 : i32
    return %arg0, %c0_i32, %c0_i32_0 : i32, i32, i32
  }
  func.func @transform_12(%arg0: i32, %arg1: i32) -> (i32, i32, i32, i32) {
    %c0_i32 = arith.constant 0 : i32
    %c0_i32_0 = arith.constant 0 : i32
    %c0_i32_1 = arith.constant 0 : i32
    return %arg0, %arg1, %c0_i32, %c0_i32_0 : i32, i32, i32, i32
  }
}

</mosaic_0001>

<bundles_post_ra>
// kernel: multi_head_attention.1
= control target key start
LH: loop header
LB: loop body
LE: loop exit
PB: predicated region body
PF: predicated region fallthrough
CT: control target
= control target key end

     0   :  { %s2110_s0 = inlined_call_operand.vmem [shape: f32[2,8,32], index: 0, kind: input, shape index: {}]   ;;  %s2111_s1 = inlined_call_operand.vmem [shape: f32[2,8,32], index: 1, kind: input, shape index: {}]   ;;  %s2112_s2 = inlined_call_operand.vmem [shape: f32[2,8,32], index: 2, kind: input, shape index: {}]   ;;  %s2113_s3 = inlined_call_operand.vmem [shape: f32[4,32,8], index: 3, kind: input, shape index: {}]   ;;  %s2114_s4 = inlined_call_operand.vmem [shape: f32[4,32,8], index: 4, kind: input, shape index: {}]   ;;  %s2115_s5 = inlined_call_operand.vmem [shape: f32[4,32,8], index: 5, kind: input, shape index: {}]   ;;  %s2116_s6 = inlined_call_operand.vmem [shape: f32[4,1,8], index: 6, kind: input, shape index: {}]   ;;  %s2117_s7 = inlined_call_operand.vmem [shape: f32[4,1,8], index: 7, kind: input, shape index: {}]   ;;  %s2118_s8 = inlined_call_operand.vmem [shape: f32[4,1,8], index: 8, kind: input, shape index: {}]   ;;  %s2119_s9 = inlined_call_operand.vmem [shape: f32[4,8,32], index: 9, kind: input, shape index: {}]   ;;  %s2120_s10 = inlined_call_operand.vmem [shape: f32[1,32], index: 10, kind: input, shape index: {}]   ;;  %s2121_s11 = inlined_call_operand.hbm [shape: f32[2,8,32], index: 11, kind: output, shape index: {0}]   ;;  %s2122_s12 = inlined_call_operand.hbm [shape: f32[2,4,8,8], index: 12, kind: output, shape index: {1}]  }
   0x1   :  { %2136 = sst [smem:[#allocation16_spill]] %s2110_s0 }
   0x2   :  { %2137 = sst [smem:[#allocation17_spill]] %s2111_s1 }
   0x3   :  { %2138 = sst [smem:[#allocation18_spill]] %s2112_s2 }
   0x4   :  { %2139 = sst [smem:[#allocation19_spill]] %s2113_s3 }
   0x5   :  { %2140 = sst [smem:[#allocation20_spill]] %s2114_s4 }
   0x6   :  { %2141 = sst [smem:[#allocation21_spill]] %s2115_s5 }
   0x7   :  { %2142 = sst [smem:[#allocation22_spill]] %s2119_s9 }
   0x8   :  { %2143 = sst [smem:[#allocation23_spill]] %s2120_s10 }
   0x9   :  { %2144 = sst [smem:[#allocation24_spill]] %s2121_s11 }
   0xa   :  { %2145 = sst [smem:[#allocation25_spill]] %s2122_s12 }
   0xb   :  { %18 = vsyncpa [#allocation4], 0 }
   0xc   :  { %20 = vsyncpa [#allocation4 + $0x1], 0 }
   0xd   :  { %21 = vsyncpa [#allocation6], 0 }
   0xe   :  { %23 = vsyncpa [#allocation6 + $0x1], 0  ;;  %s1796_s21 = smov 0   ;;  %s1798_s22 = smov 0  }
   0xf   :  { %s1800_s23 = smov 0   ;;  %s1802_s24 = smov 0  }
  0x10   :  { %s1804_s25 = smov 0   ;;  %s1806_s26 = smov 0  }
  0x11   :  { %s1808_s27 = smov 0   ;;  %s1810_s28 = smov 0  }
  0x12   :  { %s1812_s29 = smov 0   ;;  %s1814_s30 = smov 0  }
  0x13   :  { %s1816_s13 = smov 0  }
  0x14 LB: > { %2146 = sst [smem:[#allocation9_spill]] %s1695_s24  ;;  %s1338_s14 = sadd.s32 4294967295, %s1723_s13   ;;  %s1723_s13 = sphi %s1816_s13, %s29_s13   ;;  %s1719_s30 = sphi %s1814_s30, %s2179_s30   ;;  %s1715_s29 = sphi %s1812_s29, %s2186_s29   ;;  %s1711_s28 = sphi %s1810_s28, %s2177_s28   ;;  %s1707_s27 = sphi %s1808_s27, %s2176_s27   ;;  %s1703_s26 = sphi %s1806_s26, %s2185_s26   ;;  %s1699_s25 = sphi %s1804_s25, %s2184_s25   ;;  %s1695_s24 = sphi %s1802_s24, %s2183_s24   ;;  %s1691_s23 = sphi %s1800_s23, %s2182_s23   ;;  %s1687_s22 = sphi %s1798_s22, %s2181_s22   ;;  %s1683_s21 = sphi %s1796_s21, %s2180_s21  }
  0x15   : > { %2147 = sst [smem:[#allocation10_spill]] %s1715_s29  ;;  %s1339_s15 = sadd.s32 4294967294, %s1723_s13  }
  0x16   : > { %2148 = sst [smem:[#allocation11_spill]] %s1719_s30  ;;  %s38_s16 = sadd.s32 1, %s1715_s29 }
  0x17   : > { %s41_s17 = sadd.s32 1, %s1719_s30  ;;  %p39_p0 = scmp.ge.s32.totalorder %s38_s16, 4 }
  0x18   : > { %s329_s18 = sadd.s32 1, %s1703_s26  ;;  %p339_p1 = scmp.ne.s32.totalorder %s1703_s26, %s1699_s25 }
  0x19   : > { %p1858_p2 = scmp.eq.s32.totalorder %s1338_s14, 7  ;;  %s2188_s16 = smov (%p39_p0, %s38_s16), 0 }
  0x1a   : > { %2150 = sst [smem:[#allocation12_spill]] %s2188_s16  ;;  %s2190_s17 = smov (!%p39_p0, %s41_s17), %s1719_s30 }
  0x1b   : > { %p1867_p3 = por %p1858_p2, %p339_p1  ;;  %p345_p4 = scmp.ne.s32.totalorder %s1699_s25, %s1695_s24 }
  0x1c   : > { %p43_p5 = scmp.ge.s32.totalorder %s2190_s17, 2  ;;  %p1873_p6 = scmp.eq.s32.totalorder %s1339_s15, 7 }
  0x1d   : > { %s2151_s20 = scalar_select %p1867_p3, 1, 0 }
  0x1e   : > { %s353_s12 = ssub.s32 %s1715_s29, %s2188_s16  ;;  %s357_s11 = sadd.s32 1, %s1691_s23 }
  0x1f   : > { %2152 = sst [smem:[#allocation13_spill]] %s2151_s20  ;;  %s2192_s17 = smov (%p43_p5, %s2190_s17), 0 }
  0x20   : > { %2154 = sst [smem:[#allocation14_spill]] %s2192_s17  ;;  %p1884_p7 = por %p1873_p6, %p345_p4 }
  0x21   : > { %p367_p8 = scmp.ne.s32.totalorder %s1691_s23, %s1687_s22  ;;  %s326_s24 = ssub.s32 %s1719_s30, %s2192_s17 }
  0x22   : > { %p373_p9 = scmp.ne.s32.totalorder %s1687_s22, %s1683_s21  ;;  %p327_p10 = scmp.eq.s32.totalorder %s326_s24, 0 }
  0x23   : > { %s354_s15 = sor.u32 %s353_s12, %s326_s24  ;;  %p1896_p12 = por %p367_p8, %p1858_p2 }
  0x24   : > { %p355_p11 = scmp.eq.s32.totalorder %s354_s15, 0  ;;  %p1908_p13 = por %p373_p9, %p1873_p6 }
  0x25   : > { %s1901_s16 = scalar_select %p327_p10, %s1703_s26, %s329_s18  }
  0x26   : > { %s1904_s29 = scalar_select %p355_p11, %s1691_s23, %s357_s11  }
  0x27   : > { %2157 = sst [smem:[#allocation15_spill]] %s1901_s16  ;;  %p1342_p0 = scmp.ge.s32.totalorder %s1723_s13, 1 }
  0x28   : > { %s2158_s9 = scalar_select %p1908_p13, 1, 0 }
  0x29   : > { %p465_p1 = scmp.lt.s32.totalorder %s1723_s13, 9 }
  0x2b   : > { %p466_p4 = pnand %p1342_p0, %p465_p1 }
  0x2c   : > { %p559_p2 = scmp.lt.s32.totalorder (!%p466_p4), %s1707_s27, 3  ;;  %s2130_s12 = sand.u32 (!%p466_p4), 1, %s1699_s25   ;;  %v1725_v0 = vmov (!%p466_p4), 0.0|0.0   ;;  %vm1726_vm0 = vmmov (!%p466_p4), 0   ;;  %v1727_v1 = vmov (!%p466_p4), 0.0   ;;  %vm601_vm1 = vcmask (!%p466_p4), 261120  }
  0x2d   : > { %469 = sbr.rel (%p466_p4) target bundleno = 1302 (0x516), region = 64  ;;  %1453 = vmatprep.subr.bf16.mxu1 (!%p466_p4), %v1725_v0  ;;  %s1919_s11 = sshll.u32 (!%p466_p4), %s2130_s12, 3  ;;  %1447 = vmatprep.subr.bf16.mxu0 (!%p466_p4), %v1725_v0  ;;  %vm843_vm2 = vcmask (!%p466_p4), 64512  }
  0x2e   : > { %1418 = vmatprep.mubr.msk.f32.mxu1 (!%p466_p4), %vm1726_vm0, %v1727_v1  ;;  %1407 = vmatprep.mubr.msk.f32.mxu0 (!%p466_p4), %vm1726_vm0, %v1727_v1  ;;  %p547_p5 = scmp.lt.s32.totalorder (!%p466_p4), %s1711_s28, 1  ;;  %s2159_s4 = sld [smem:[#allocation20_spill]] (!%p466_p4) }
  0x2f   : > { %s2160_s3 = sld [smem:[#allocation19_spill]] (!%p466_p4)  ;;  %s2161_s1 = sld [smem:[#allocation17_spill]] (!%p466_p4) }
  0x30   : > { %s2162_s0 = sld [smem:[#allocation16_spill]] (!%p466_p4)  ;;  %s2163_s5 = sld [smem:[#allocation21_spill]] (!%p466_p4) }
  0x31   : > { %s2164_s2 = sld [smem:[#allocation18_spill]] (!%p466_p4)  ;;  %p1365_p6 = scmp.ne.s32.totalorder (!%p466_p4), %s1707_s27, 0 }
  0x34   : > { %s1923_s24 = scalar_select %p559_p2, %s1707_s27, 3 }
  0x35   : > { %s548_s16 = scalar_select %p547_p5, %s1711_s28, 1 }
  0x36   : > { %s1931_s18 = sshll.u32 %s1923_s24, 5  ;;  %s579_s12 = scalar_lea.vmem %s2117_s7, %s1923_s24  ;;  %v1728_v51 = vmov (!%p1365_p6), 0.0  }
  0x37   : > { %s568_s15 = scalar_lea.vmem %s2159_s4, %s1931_s18  ;;  %s563_s30 = scalar_lea.vmem %s2160_s3, %s1931_s18  ;;  %v1357_v16 = vld [vmem:[%s579_s12] ss:$0 sm:$0xff]  ;;  %1083 = vst.msk [vmem:[#allocation2] sm:$0xff] (!%p1365_p6), %vm601_vm1, %v1728_v51 }
  0x38   : > { %v675_v2 = vld [vmem:[%s568_s15] sm:$0xff]  ;;  %v676_v3 = vld [vmem:[%s568_s15 + $0x8] sm:$0xff]  ;;  %v677_v4 = vld [vmem:[%s568_s15 + $0x10] sm:$0xff]  ;;  %s1942_s19 = sshll.u32 %s548_s16, 3  ;;  %s573_s17 = scalar_lea.vmem %s2163_s5, %s1931_s18 }
  0x39   : > { %v1454_v5 = vpack.c.bf16 %v676_v3, %v675_v2  ;;  %v590_v6 = vld [vmem:[%s563_s30] sm:$0xff]  ;;  %v591_v7 = vld [vmem:[%s563_s30 + $0x8] sm:$0xff]  ;;  %v678_v8 = vld [vmem:[%s568_s15 + $0x18] sm:$0xff]  ;;  %s554_s14 = scalar_lea.vmem %s2161_s1, %s1942_s19  ;;  %s550_s3 = scalar_lea.vmem %s2162_s0, %s1942_s19 }
  0x3a   : > { %v1448_v9 = vpack.c.bf16 %v591_v7, %v590_v6  ;;  %v592_v10 = vld [vmem:[%s563_s30 + $0x10] sm:$0xff]  ;;  %v593_v11 = vld [vmem:[%s563_s30 + $0x18] sm:$0xff]  ;;  %v1457_v12 = vpack.c.bf16 %v678_v8, %v677_v4  ;;  %v588_v14 = vld [vmem:[%s554_s14] sm:$0xff]  ;;  %s576_s15 = scalar_lea.vmem %s2116_s6, %s1923_s24  ;;  %s558_s14 = scalar_lea.vmem %s2164_s2, %s1942_s19 }
  0x3b   : > { %1455 = vmatpush3.bf16.msra.mxu1 %v1454_v5  ;;  %v1451_v13 = vpack.c.bf16 %v593_v11, %v592_v10  ;;  %v587_v15 = vld [vmem:[%s550_s3] sm:$0xff]  ;;  %v760_v25 = vld [vmem:[%s573_s17 + $0x8] sm:$0xff]  ;;  %v761_v26 = vld [vmem:[%s573_s17 + $0x10] sm:$0xff]  ;;  %s1354_s30 = sshll.u32 %s1923_s24, 3  ;;  %s2165_s12 = sld [smem:[#allocation22_spill]] }
  0x3c   : > { %1449 = vmatpush3.bf16.msra.mxu0 %v1448_v9  ;;  %1456 = vmatprep.subr.bf16.mxu1 %v1725_v0  ;;  %v1355_v17 = vld [vmem:[%s576_s15] ss:$0 sm:$0xff]  ;;  %v762_v28 = vld [vmem:[%s573_s17 + $0x18] sm:$0xff]  ;;  %s582_s15 = scalar_lea.vmem %s2118_s8, %s1923_s24  ;;  %s539_s24 = scalar_lea.vmem [#allocation3], %s1919_s11 }
  0x3d   : > { %1450 = vmatprep.subr.bf16.mxu0 %v1725_v0  ;;  %v759_v24 = vld [vmem:[%s573_s17] sm:$0xff]  ;;  %v1463_v29 = vpack.c.bf16 %v762_v28, %v761_v26 }
  0x3e   : > { %v1460_v27 = vpack.c.bf16 %v760_v25, %v759_v24  ;;  %v589_v30 = vld [vmem:[%s558_s14] sm:$0xff]  ;;  %s2133_s14 = sand.u32 1, %s1687_s22  }
  0x3f   : > { %1458 = vmatpush3.bf16.msra.mxu1 %v1457_v12  ;;  %v1359_v40 = vld [vmem:[%s582_s15] ss:$0 sm:$0xff]  ;;  %s2001_s0 = sshll.u32 %s2133_s14, 3 }
  0x40   : > { %1452 = vmatpush3.bf16.msra.mxu0 %v1451_v13  ;;  %1432 = vmatprep.subr.mxu1 %v1727_v1  ;;  %s2134_s18 = scalar_lea.vmem [#allocation5], %s2001_s0 }
  0x41   : > { %1459 = vmatprep.subr.bf16.mxu0 %v1725_v0  ;;  %s586_s3 = scalar_lea.vmem %s2165_s12, %s1354_s30 }
  0x42   : > { %1419 = vmatmul.mubr.msk.f32.vlgmr.msra.gmra.mrb[0].mxu1 %vm601_vm1, %v588_v14  ;;  %v1005_v43 = vld [vmem:[%s586_s3] sm:$0xff] }
  0x43   : > { %1408 = vmatmul.mubr.msk.f32.vlgmr.msra.gmra.mrb[0].mxu0 %vm601_vm1, %v587_v15  ;;  %1434 = vmatprep.mubr.msk.f32.mxu1 %vm1726_vm0, %v1727_v1 }
  0x44   : > { %1429 = vmatprep.mubr.msk.f32.mxu0 %vm1726_vm0, %v1727_v1  ;;  %1461 = vmatpush3.bf16.msra.mxu0 %v1460_v27 }
  0x45   : > { %1462 = vmatprep.subr.bf16.mxu0 %v1725_v0 }
  0x48   : > { %1464 = vmatpush3.bf16.msra.mxu0 %v1463_v29 }
  0x49   : > { %1442 = vmatprep.subr.mxu0 %v1727_v1 }
  0x4b   : > { %1430 = vmatmul.mubr.msk.f32.vlgmr.msra.gmra.mrb[2].mxu0 %vm601_vm1, %v589_v30 }
  0x4c   : > { %1444 = vmatprep.mubr.msk.f32.mxu0 %vm1726_vm0, %v1727_v1  ;;  %1443 = vmatpush3.msra.mxu0 %v1005_v43 }
 0x115   : > { %v755_v18 = vpop.f32.mrb[0].mxu1 }
 0x116   : > { %v756_v19 = vadd.f32 %v1357_v16, %v755_v18  ;;  %v1420_v20 = vpop.f32.mrb[1].mxu1  ;;  %v671_v21 = vpop.f32.mrb[0].mxu0 }
 0x117   : > { %v672_v22 = vadd.f32 %v1355_v17, %v671_v21  ;;  %v1409_v23 = vpop.f32.mrb[1].mxu0 }
 0x118   : > { %1433 = vmatpush3.xpose.msk.msra.mxu1 %vm843_vm2, %v756_v19 }
 0x119   : > { %1437 = vmatprep.subr.mxu1 %v1727_v1 }
 0x11b   : > { %1435 = vmatmul.mubr.msk.f32.vlgmr.msra.gmra.mrb[2].mxu1 %vm843_vm2, %v672_v22 }
 0x11c   : > { %1439 = vmatprep.mubr.msk.f32.mxu1 %vm1726_vm0, %v1727_v1 }
 0x11e   : > { %v839_v39 = vpop.f32.mrb[2].mxu0 }
 0x11f   : > { %v1431_v41 = vpop.f32.mrb[3].mxu0  ;;  %v840_v42 = vadd.f32 %v1359_v40, %v839_v39 }
 0x121   : > { %1438 = vmatpush3.msra.mxu1 %v840_v42 }
 0x1ee   : > { %v916_v31 = vpop.f32.mrb[2].mxu1 }
 0x1ef   : > { %v1436_v32 = vpop.f32.mrb[3].mxu1  ;;  %v920_v33 = vsel %vm843_vm2, %v916_v31, -inf }
 0x1f0   : > { %921 = vmax.xlane.f32.xlu0 %v920_v33 }
 0x27d   : > { %v922_v34 = vpop.xlane.xlu0 %921 }
 0x27e   : > { %v923_v35 = vsub.f32 %v916_v31, %v922_v34 }
 0x280   : > { %v924_v36 = vmul.f32 1.442695, %v923_v35 }
 0x282   : > { %1569 = vpow2.f32 %v924_v36 }
 0x28c   : > { %v1570_v37 = vpop.eup %1569 }
 0x28d   : > { %v926_v38 = vsel %vm843_vm2, %v1570_v37, 0.0 }
 0x28e   : > { %927 = vadd.xlane.f32.xlu0 %v926_v38 }
 0x31b   : > { %v928_v44 = vpop.xlane.xlu0 %927 }
 0x31c   : > { %1571 = vrcp.f32 %v928_v44 }
 0x326   : > { %v1572_v45 = vpop.eup %1571 }
 0x327   : > { %v930_v46 = vmul.f32 %v1572_v45, %v1570_v37 }
 0x329   : > { %931 = vst.msk [vmem:[%s2134_s18] sm:$0xff] %vm843_vm2, %v930_v46  ;;  %1440 = vmatmul.mubr.msk.f32.vlgmr.msra.gmra.mrb[4].mxu1 %vm843_vm2, %v930_v46 }
 0x3fc   : > { %v1001_v47 = vpop.f32.mrb[4].mxu1 }
 0x3fd   : > { %v1441_v48 = vpop.f32.mrb[5].mxu1  ;;  %1445 = vmatmul.mubr.msk.f32.vlgmr.msra.gmra.mrb[4].mxu0 %vm843_vm2, %v1001_v47 }
 0x4cb   : > { %1082 = sbr.rel (%p1365_p6) target bundleno = 1234 (0x4d2), region = 68 }
 0x4d0   : > { %v1075_v49 = vpop.f32.mrb[4].mxu0 }
 0x4d1   : > { %v1446_v50 = vpop.f32.mrb[5].mxu0 }
 0x4d2 PF: > { %v1084_v52 = vld [vmem:[#allocation2] sm:$0xff]  ;;  %p1366_p8 = scmp.ne.s32.totalorder %s1707_s27, 3 }
 0x4d3   : > { %v1085_v53 = vadd.f32 %v1084_v52, %v1075_v49  ;;  %s2166_s30 = sld [smem:[#allocation23_spill]] (!%p1366_p8) }
 0x4d4   : > { %1090 = sbr.rel (%p1366_p8) target bundleno = 1248 (0x4e0), region = 72 }
 0x4d5   : > { %1086 = vst.msk [vmem:[#allocation2] sm:$0xff] %vm601_vm1, %v1085_v53 }
 0x4d9   : > { %v1367_v55 = vld [vmem:[%s2166_s30] ss:$0 sm:$0xff] (!%p1366_p8) }
 0x4dc   : > { %v1091_v54 = vld [vmem:[#allocation2] sm:$0xff] }
 0x4dd   : > { %v1099_v56 = vadd.f32 %v1367_v55, %v1091_v54 }
 0x4df   : > { %1100 = vst.msk [vmem:[%s539_s24] sm:$0xff] %vm601_vm1, %v1099_v56 }
 0x4e0 PF: > { %s1370_s16 = sshll.u32 %s1711_s28, 7  ;;  %s2168_s3 = sld [smem:[#allocation24_spill]] }
 0x4e1   : > { %s1120_s18 = sshll.u32 %s539_s24, 4  ;;  %s2169_s1 = sand.u32 1, %s1699_s25   ;;  %s1121_s18 = int_to_ptr.vmem [resolvable:$true] %s1120_s18 }
 0x4e2   : > { %s1102_s2 = scalar_lea.sflag [#allocation4], %s2169_s1  ;;  %s1573_s4 = scalar_lea.vmem %s1121_s18, 128 }
 0x4e3   : > { %p1574_p9 = scmp.ne.s32.totalorder %s1121_s18, %s1573_s4  ;;  %s1729_s19 = smov [#allocation3]  }
 0x4e4   : > { %s1577_s15 = sshll.u32 %s1729_s19, 4  ;;  %s1578_s15 = int_to_ptr.vmem [resolvable:$false] %s1577_s15 }
 0x4e5   : > { %p1575_p10 = pnand %p1574_p9, %p1867_p3  ;;  %s1579_s30 = scalar_lea.vmem %s1578_s15, 256 }
 0x4e6   : > { %s2022_s14 = scalar_lea.hbm %s2168_s3, %s1370_s16  ;;  %p1580_p0 = scmp.lt.s32.totalorder %s1121_s18, %s1578_s15 }
 0x4e7   : > { %p1576_p11 = pneg %p1575_p10  ;;  %p1581_p1 = scmp.lt.s32.totalorder %s1579_s30, %s1573_s4 }
 0x4e9   : > { %p1582_p4 = por %p1581_p1, %p1580_p0 }
 0x4eb   : > { %p1583_p2 = pnand %p1582_p4, %p1576_p11 }
 0x4ed   : > { %1586 = shalt.err (!%p1583_p2)
}
 0x4ee   : > { %s1587_s1 = scalar_lea.hbm %s2022_s14, 128  ;;  %s1591_s17 = scalar_lea.hbm %s2168_s3, 256 }
 0x4ef   : > { %p1588_p5 = scmp.ne.s32.totalorder %s2022_s14, %s1587_s1  ;;  %p1592_p9 = scmp.lt.u32.totalorder %s2022_s14, %s2168_s3 }
 0x4f0   : > { %p1593_p10 = scmp.lt.u32.totalorder %s1591_s17, %s1587_s1  ;;  %p1595_p0 = scmp.lt.u32.totalorder %s1587_s1, %s2022_s14 }
 0x4f1   : > { %p1589_p6 = pnand %p1588_p5, %p1867_p3 }
 0x4f2   : > { %p1594_p11 = por %p1593_p10, %p1592_p9 }
 0x4f3   : > { %p1590_p8 = pneg %p1589_p6 }
 0x4f4   : > { %p1596_p1 = por %p1595_p0, %p1594_p11 }
 0x4f6   : > { %p1597_p4 = pnand %p1596_p1, %p1590_p8 }
 0x4f8   : > { %1600 = shalt.err (!%p1597_p4)
}
 0x4f9   : > { %1465 = dma.vmem_to_hbm [thread:$0]  (%p1867_p3), %s1121_s18, 128, %s2022_s14, %s1102_s2  }
 0x4fa   : > { %s1371_s4 = sshll.u32 %s1711_s28, 2  ;;  %s2170_s15 = scalar_lea.vmem [#allocation5], %s2001_s0 }
 0x4fb   : > { %s1135_s30 = sshll.u32 %s2170_s15, 4  ;;  %s1131_s24 = sadd.s32 %s1707_s27, %s1371_s4  ;;  %s2047_s30 = int_to_ptr.vmem [resolvable:$true] %s1135_s30 }
 0x4fc   : > { %s1372_s1 = sshll.u32 %s1131_s24, 7  ;;  %s2171_s11 = sld [smem:[#allocation25_spill]] }
 0x4fd   : > { %s2172_s19 = sand.u32 1, %s1687_s22   ;;  %s1601_s5 = scalar_lea.vmem %s2047_s30, 128 }
 0x4fe   : > { %s1107_s3 = scalar_lea.sflag [#allocation6], %s2172_s19  ;;  %p1602_p2 = scmp.ne.s32.totalorder %s2047_s30, %s1601_s5 }
 0x4ff   : > { %s1730_s0 = smov [#allocation5]  }
 0x500   : > { %p1603_p3 = pnand %p1602_p2, %p1896_p12  ;;  %s1605_s2 = sshll.u32 %s1730_s0, 4  ;;  %s1606_s2 = int_to_ptr.vmem [resolvable:$false] %s1605_s2 }
 0x501   : > { %s1607_s27 = scalar_lea.vmem %s1606_s2, 256  ;;  %p1608_p6 = scmp.lt.s32.totalorder %s2047_s30, %s1606_s2 }
 0x502   : > { %s1133_s12 = scalar_lea.hbm %s2171_s11, %s1372_s1  ;;  %p1604_p5 = pneg %p1603_p3 }
 0x503   : > { %p1609_p8 = scmp.lt.s32.totalorder %s1607_s27, %s1601_s5 }
 0x505   : > { %p1610_p9 = por %p1609_p8, %p1608_p6 }
 0x507   : > { %p1611_p10 = pnand %p1610_p9, %p1604_p5 }
 0x509   : > { %1614 = shalt.err (!%p1611_p10)
}
 0x50a   : > { %s1615_s28 = scalar_lea.hbm %s1133_s12, 128  ;;  %s1619_s4 = scalar_lea.hbm %s2171_s11, 1024 }
 0x50b   : > { %p1616_p11 = scmp.ne.s32.totalorder %s1133_s12, %s1615_s28  ;;  %p1620_p4 = scmp.lt.u32.totalorder %s1133_s12, %s2171_s11 }
 0x50c   : > { %p1621_p2 = scmp.lt.u32.totalorder %s1619_s4, %s1615_s28  ;;  %p1623_p13 = scmp.lt.u32.totalorder %s1615_s28, %s1133_s12 }
 0x50d   : > { %p1617_p0 = pnand %p1616_p11, %p1896_p12 }
 0x50e   : > { %p1622_p3 = por %p1621_p2, %p1620_p4 }
 0x50f   : > { %p1618_p1 = pneg %p1617_p0 }
 0x510   : > { %p1624_p6 = por %p1623_p13, %p1622_p3 }
 0x512   : > { %p1625_p5 = pnand %p1624_p6, %p1618_p1 }
 0x514   : > { %1628 = shalt.err (!%p1625_p5)
}
 0x515   : > { %1466 = dma.vmem_to_hbm [thread:$0]  (%p1896_p12), %s2047_s30, 128, %s1133_s12, %s1107_s3  }
 0x516 PF: > { %s2173_s5 = sld [smem:[#allocation9_spill]]  ;;  %p1476_p8 = scmp.ge.s32.totalorder %s1723_s13, 2 }
 0x518   : > { %p1470_p9 = pnand %p1476_p8, %p1884_p7 }
 0x51c   : > { %s1147_s1 = sand.u32 1, %s2173_s5  }
 0x51d   : > { %s1148_s16 = scalar_lea.sflag [#allocation4], %s1147_s1 }
 0x51e   : > { %1674 = dma.done.wait (!%p1470_p9), %s1148_s16, 128  }
 0x51f   : > { %1676 = vsyncadd (!%p1470_p9), %s1148_s16, 4294967168  ;;  %s1156_s17 = sand.u32 1, %s1683_s21   ;;  %p2174_p13 = scmp.ne.s32.totalorder %s2158_s9, 0 }
 0x520   : > { %s1157_s19 = scalar_lea.sflag [#allocation6], %s1156_s17 }
 0x521   : > { %p1473_p10 = pnand %p1476_p8, %p2174_p13 }
 0x523   : > { %1678 = dma.done.wait (!%p1473_p10), %s1157_s19, 128  }
 0x524   : > { %1680 = vsyncadd (!%p1473_p10), %s1157_s19, 4294967168  ;;  %s29_s13 = sadd.s32 1, %s1723_s13   ;;  %s2175_s10 = sld [smem:[#allocation15_spill]] }
 0x525   : > { %p26_p12 = scmp.ge.s32.totalorder %s29_s13, 10   ;;  %s2176_s27 = sld [smem:[#allocation10_spill]] }
 0x526   : > { %s2177_s28 = sld [smem:[#allocation11_spill]]  ;;  %s2178_s20 = sld [smem:[#allocation12_spill]] }
 0x527   : > { %s2179_s30 = sld [smem:[#allocation14_spill]]  ;;  %s2180_s21 = smov %s1687_s22 }
 0x528   : > { %s2181_s22 = smov %s1691_s23  ;;  %s2182_s23 = smov %s1904_s29 }
 0x529   : > { %s2183_s24 = smov %s1699_s25  ;;  %s2184_s25 = smov %s1703_s26 }
 0x52a   : > { %s2185_s26 = smov %s2175_s10  ;;  %28 = sbr.rel (!%p26_p12) target bundleno = 20 (0x14), region = 151 }
 0x52c   : > { %s2186_s29 = smov %s2178_s20 }
 0x531   :  { %1162 = vsyncpa [#allocation4], 1 }
 0x532   :  { %1164 = vsyncpa [#allocation4 + $0x1], 1 }
 0x533   :  { %1165 = vsyncpa [#allocation6], 1 }
 0x534   :  { %1167 = vsyncpa [#allocation6 + $0x1], 1 }

</bundles_post_ra>
